<compile_context>
chip_gen: v6e
topology: v6e:2x2x1
jax: 0.10.0
libtpu: 0.0.40
codegen_flags: <defaults>
</compile_context>

<pallas_src>
import jax
import jax.numpy as jnp
from jax.experimental import pallas as pl
from jax.experimental.pallas import tpu as pltpu


def _make_conv1x1_tanh_kernel(bt):
    """Kernel computing tanh(W @ x) for `bt` images per grid step."""

    def kernel(x_ref, w_ref, o_ref):
        # x_ref: (bt, C, t_hw)   w_ref: (OUT, C)   o_ref: (bt, OUT, t_hw)
        w = w_ref[...]
        for bi in range(bt):  # static unroll; bt is small
            acc = jnp.dot(w, x_ref[bi], preferred_element_type=jnp.float32)
            o_ref[bi] = jnp.tanh(acc).astype(o_ref.dtype)

    return kernel


def _round_down_128(n):
    return (n // 128) * 128


def _round_up_128(n):
    return ((n + 127) // 128) * 128


def conv1x1_tanh_nchw(x, w_oc, *, target_bytes=8 << 20):
    """x: (B, C, H, W) NCHW.  w_oc: (OUT, C).  Returns (B, OUT, H, W)."""
    B, C, H, W = x.shape
    OUT = w_oc.shape[0]
    HW = H * W
    itemsize = jnp.dtype(x.dtype).itemsize

    x3 = x.reshape(B, C, HW)  # free, layout-preserving reshape

    # ---- Tile selection (sized by bytes of the input tile) -----------------
    bytes_per_pixel = C * itemsize
    target_pixels = max(128, _round_down_128(target_bytes // bytes_per_pixel))

    if HW > target_pixels:
        # Large image: stream spatially, one image per step; edge block masked.
        bt = 1
        t_hw = target_pixels
    else:
        # Small image: full spatial extent, fold several images per step so the
        # per-step DMA stays multi-MiB (capped for trace-time sanity).
        t_hw = HW
        bytes_per_image = max(1, C * HW * itemsize)
        bt = max(1, min(B, target_bytes // bytes_per_image, 64))

    # Megacore (v7x, 2 TCs): make sure there are >= 2 parallel grid steps when
    # the batch axis alone can't provide them.
    if B == 1 and bt == 1 and HW > 256 and pl.cdiv(HW, t_hw) < 2:
        half = _round_up_128((HW + 1) // 2)
        if half < HW:
            t_hw = half

    grid = (pl.cdiv(B, bt), pl.cdiv(HW, t_hw))

    # ---- Explicit VMEM budget (double-buffered in + out + weight) ----------
    needed = (
        2 * bt * C * t_hw * itemsize      # input, double buffered
        + 2 * bt * OUT * t_hw * itemsize  # output, double buffered
        + 2 * OUT * C * itemsize          # resident weight
    )
    vmem_limit = int(min(max(needed + (4 << 20), 32 << 20), 56 << 20))

    out = pl.pallas_call(
        _make_conv1x1_tanh_kernel(bt),
        out_shape=jax.ShapeDtypeStruct((B, OUT, HW), x.dtype),
        grid_spec=pltpu.PrefetchScalarGridSpec(
            num_scalar_prefetch=0,
            grid=grid,
            in_specs=[
                # activation tile: (bt, C, t_hw); lane axis = pixels (dense)
                pl.BlockSpec((bt, C, t_hw), lambda b, i: (b, 0, i)),
                # tiny weight, constant index_map -> stays resident in VMEM
                pl.BlockSpec((OUT, C), lambda b, i: (0, 0)),
            ],
            # lane-dense output tile (t_hw multiple of 128, or full HW extent)
            out_specs=pl.BlockSpec((bt, OUT, t_hw), lambda b, i: (b, 0, i)),
        ),
        compiler_params=pltpu.CompilerParams(
            # no reduction grid axes -> both parallel (megacore sharding)
            dimension_semantics=("parallel", "parallel"),
            vmem_limit_bytes=vmem_limit,
        ),
    )(x3, w_oc)

    return out.reshape(B, OUT, H, W)


class GetImageTanh1x1:
    """JAX/Pallas equivalent of GET_IMAGE_Tanh1x1(ngf)."""

    def __init__(self, ngf, key=None, dtype=jnp.float32):
        self.ngf = ngf
        if key is None:
            key = jax.random.PRNGKey(42)
        # torch Conv2d weight is (out=3, in=ngf, 1, 1); store the squeezed
        # (3, ngf) matmul form directly (pre-transposed once at init).
        bound = 1.0 / jnp.sqrt(jnp.array(ngf, dtype=jnp.float32))
        self.weight = jax.random.uniform(
            key, (3, ngf), dtype=dtype, minval=-bound, maxval=bound
        )

    def __call__(self, h_code):
        # h_code: NCHW (B, ngf, H, W)  ->  NCHW (B, 3, H, W)
        B, C, H, W = h_code.shape
        assert C == self.ngf
        return conv1x1_tanh_nchw(h_code, self.weight)


if __name__ == "__main__":
    key = jax.random.PRNGKey(0)
    k_x, k_w = jax.random.split(key)

    B, ngf, Hs, Ws = 2, 4, 16, 16
    x = jax.random.normal(k_x, (B, ngf, Hs, Ws), dtype=jnp.float32)

    model = GetImageTanh1x1(ngf, key=k_w)
    y = model(x)
    y = jax.block_until_ready(y)

    # Pure-JAX reference of the same math (weight stored as (3, ngf) = (o, c)).
    ref = jnp.tanh(jnp.einsum("bchw,oc->bohw", x, model.weight))
    assert y.shape == (B, 3, Hs, Ws)
    assert jnp.allclose(y, ref, atol=1e-5, rtol=1e-5)

    print("KERNEL_OK")
</pallas_src>

<mosaic_0001>
module attributes {stable_mosaic.version = 11 : i64} {
  func.func @kernel(%arg0: i32, %arg1: i32, %arg2: memref<2x4x256xf32, #tpu.memory_space<vmem>>, %arg3: memref<3x4xf32, #tpu.memory_space<vmem>>, %arg4: memref<2x3x256xf32, #tpu.memory_space<vmem>>) attributes {dimension_semantics = [#tpu.dimension_semantics<parallel>, #tpu.dimension_semantics<parallel>], iteration_bounds = array<i64: 1, 1>, scalar_prefetch = 0 : i64, scratch_operands = 0 : i64, tpu.core_type = #tpu.core_type<tc>, window_params = [{transform_indices = @transform_0, window_bounds = array<i64: 2, 4, 256>}, {pipeline_mode = #tpu.pipeline_mode<synchronous>, transform_indices = @transform_1, window_bounds = array<i64: 3, 4>}, {transform_indices = @transform_2, window_bounds = array<i64: 2, 3, 256>}]} {
    %c0 = arith.constant 0 : index
    %c0_0 = arith.constant 0 : index
    %0 = vector.load %arg3[%c0, %c0_0] : memref<3x4xf32, #tpu.memory_space<vmem>>, vector<3x4xf32>
    %c0_1 = arith.constant 0 : index
    %c0_2 = arith.constant 0 : index
    %c0_3 = arith.constant 0 : index
    %1 = vector.load %arg2[%c0_1, %c0_2, %c0_3] : memref<2x4x256xf32, #tpu.memory_space<vmem>>, vector<1x4x256xf32>
    %2 = vector.shape_cast %1 : vector<1x4x256xf32> to vector<4x256xf32>
    %cst = arith.constant dense<0.000000e+00> : vector<3x256xf32>
    %3 = tpu.matmul %0, %2, %cst {dimension_numbers = #tpu.dot_dimension_numbers<[1], [0], [0], [1], [0, 0, 1, 1], [], []>} : vector<3x4xf32>, vector<4x256xf32>, vector<3x256xf32> -> vector<3x256xf32>
    %4 = math.tanh %3 : vector<3x256xf32>
    %c0_4 = arith.constant 0 : index
    %c0_5 = arith.constant 0 : index
    %c0_6 = arith.constant 0 : index
    %5 = vector.load %arg4[%c0_4, %c0_5, %c0_6] : memref<2x3x256xf32, #tpu.memory_space<vmem>>, vector<1x3x256xf32>
    %6 = vector.shape_cast %5 : vector<1x3x256xf32> to vector<3x256xf32>
    %7 = vector.shape_cast %4 : vector<3x256xf32> to vector<1x3x256xf32>
    tpu.vector_store %arg4[%c0_4, %c0_5, %c0_6], %7 {strides = array<i32>} : memref<2x3x256xf32, #tpu.memory_space<vmem>>, vector<1x3x256xf32>,
    %c1 = arith.constant 1 : index
    %c0_7 = arith.constant 0 : index
    %c0_8 = arith.constant 0 : index
    %8 = vector.load %arg2[%c1, %c0_7, %c0_8] : memref<2x4x256xf32, #tpu.memory_space<vmem>>, vector<1x4x256xf32>
    %9 = vector.shape_cast %8 : vector<1x4x256xf32> to vector<4x256xf32>
    %cst_9 = arith.constant dense<0.000000e+00> : vector<3x256xf32>
    %10 = tpu.matmul %0, %9, %cst_9 {dimension_numbers = #tpu.dot_dimension_numbers<[1], [0], [0], [1], [0, 0, 1, 1], [], []>} : vector<3x4xf32>, vector<4x256xf32>, vector<3x256xf32> -> vector<3x256xf32>
    %11 = math.tanh %10 : vector<3x256xf32>
    %c1_10 = arith.constant 1 : index
    %c0_11 = arith.constant 0 : index
    %c0_12 = arith.constant 0 : index
    %12 = vector.load %arg4[%c1_10, %c0_11, %c0_12] : memref<2x3x256xf32, #tpu.memory_space<vmem>>, vector<1x3x256xf32>
    %13 = vector.shape_cast %12 : vector<1x3x256xf32> to vector<3x256xf32>
    %14 = vector.shape_cast %11 : vector<3x256xf32> to vector<1x3x256xf32>
    tpu.vector_store %arg4[%c1_10, %c0_11, %c0_12], %14 {strides = array<i32>} : memref<2x3x256xf32, #tpu.memory_space<vmem>>, vector<1x3x256xf32>,
    return
  }
  func.func @transform_0(%arg0: i32, %arg1: i32) -> (i32, i32, i32) {
    %c0_i32 = arith.constant 0 : i32
    %c0_i32_0 = arith.constant 0 : i32
    return %arg0, %c0_i32, %arg1 : i32, i32, i32
  }
  func.func @transform_1(%arg0: i32, %arg1: i32) -> (i32, i32) {
    %c0_i32 = arith.constant 0 : i32
    %c0_i32_0 = arith.constant 0 : i32
    %c0_i32_1 = arith.constant 0 : i32
    return %c0_i32, %c0_i32_0 : i32, i32
  }
  func.func @transform_2(%arg0: i32, %arg1: i32) -> (i32, i32, i32) {
    %c0_i32 = arith.constant 0 : i32
    %c0_i32_0 = arith.constant 0 : i32
    return %arg0, %c0_i32, %arg1 : i32, i32, i32
  }
}

</mosaic_0001>

<bundles_post_ra>
// kernel: tpu_custom_call.1
= control target key start
LH: loop header
LB: loop body
LE: loop exit
PB: predicated region body
PF: predicated region fallthrough
CT: control target
= control target key end

     0   :  { %7 = vsyncpa [#allocation3], 0  ;;  %s319_s0 = inlined_call_operand.hbm [shape: f32[2,4,256], index: 0, kind: input, shape index: {}]   ;;  %s320_s1 = inlined_call_operand.hbm [shape: f32[3,4], index: 1, kind: input, shape index: {}]   ;;  %s321_s2 = inlined_call_operand.vmem [shape: f32[2,3,256], index: 2, kind: output, shape index: {}]  }
   0x1   :  { %8 = vsyncpa [#allocation5], 0  ;;  %s287_s9 = smov [#allocation2]  }
   0x2   :  { %s14_s10 = sshll.u32 %s287_s9, 4  ;;  %s15_s10 = int_to_ptr.vmem [resolvable:$true] %s14_s10 }
   0x3   :  { %s251_s11 = scalar_lea.vmem %s15_s10, 256  ;;  %p256_p1 = scmp.lt.s32.totalorder %s15_s10, %s15_s10 }
   0x4   :  { %p252_p0 = scmp.ne.s32.totalorder %s15_s10, %s251_s11  ;;  %p257_p2 = scmp.lt.s32.totalorder %s251_s11, %s251_s11 }
   0x6   :  { %p258_p3 = por %p257_p2, %p256_p1 }
   0x8   :  { %p259_p4 = pnand %p258_p3, %p252_p0 }
   0xa   :  { %262 = shalt.err (!%p259_p4)
}
   0xb   :  { %s288_s12 = smov 128   ;;  %s289_s13 = smov 8  }
   0xc   :  { %20 = dma.hbm_to_vmem [thread:$0]  %s319_s0, 256, %s15_s10, [#allocation3], %s288_s12, %s288_s12, %s289_s13  }
   0xd   :  { %s290_s16 = smov [#allocation4]  }
   0xe   :  { %s27_s17 = sshll.u32 %s290_s16, 4  ;;  %s28_s17 = int_to_ptr.vmem [resolvable:$true] %s27_s17 }
   0xf   :  { %s271_s18 = scalar_lea.vmem %s28_s17, 64  ;;  %p276_p6 = scmp.lt.s32.totalorder %s28_s17, %s28_s17 }
  0x10   :  { %p272_p5 = scmp.ne.s32.totalorder %s28_s17, %s271_s18  ;;  %p277_p7 = scmp.lt.s32.totalorder %s271_s18, %s271_s18 }
  0x12   :  { %p278_p8 = por %p277_p7, %p276_p6 }
  0x14   :  { %p279_p9 = pnand %p278_p8, %p272_p5 }
  0x16   :  { %282 = shalt.err (!%p279_p9)
}
  0x17   :  { %30 = dma.hbm_to_vmem [thread:$0]  %s320_s1, 64, %s28_s17, [#allocation5]  }
  0x18   :  { %283 = dma.done.wait [#allocation3], 256  }
  0x19   :  { %284 = vsyncadd [#allocation3], 4294967040 }
  0x1a   :  { %285 = dma.done.wait [#allocation5], 64  }
  0x1b   :  { %286 = vsyncadd [#allocation5], 4294967232  ;;  %v291_v0 = vmov 0.0   ;;  %v38_v1 = vld [vmem:[#allocation2] sm:$0xff]  ;;  %vm45_vm0 = vcmask 1043456   ;;  %v129_v2 = vld [vmem:[#allocation2 + $0x8] sm:$0xff] }
  0x1c   :  { %114 = vmatprep.mubr.f32.mxu0 %v291_v0  ;;  %200 = vmatprep.mubr.f32.mxu1 %v291_v0  ;;  %v40_v3 = vcombine.high %v38_v1, %v38_v1  ;;  %v131_v4 = vcombine.high %v129_v2, %v129_v2  ;;  %v37_v5 = vld [vmem:[#allocation4] sm:$0x7]  ;;  %vm41_vm1 = vcmask 31744  }
  0x1e   :  { %221 = vmatprep.subr.msk.mxu0 %vm45_vm0, %v40_v3  ;;  %224 = vmatprep.subr.msk.mxu1 %vm45_vm0, %v131_v4 }
  0x1f   :  { %222 = vmatpush1.msk.msra.mxu0 %vm45_vm0, %v38_v1  ;;  %225 = vmatpush1.msk.msra.mxu1 %vm45_vm0, %v129_v2 }
  0x20   :  { %223 = vmatmul.mubr.msk.f32.vlgmr.msra.gmra.mxu0 %vm41_vm1, %v37_v5  ;;  %226 = vmatmul.mubr.msk.f32.vlgmr.msra.gmra.mxu1 %vm41_vm1, %v37_v5 }
  0xe0   :  { %v116_v6 = vpop.f32.mrf.mxu0  ;;  %v202_v7 = vpop.f32.mrf.mxu1 }
  0xe1   :  { %235 = vtanh.f32 %v116_v6 }
  0xe2   :  { %237 = vtanh.f32 %v202_v7  ;;  %v118_v8 = vpop.f32.mrf.mxu0  ;;  %v204_v9 = vpop.f32.mrf.mxu1 }
  0xe3   :  { %239 = vtanh.f32 %v118_v8 }
  0xe4   :  { %241 = vtanh.f32 %v204_v9 }
  0xee   :  { %v236_v10 = vpop.eup %235 }
  0xef   :  { %v238_v11 = vpop.eup %237 }
  0xf0   :  { %v240_v12 = vpop.eup %239 }
  0xf1   :  { %v242_v13 = vpop.eup %241  ;;  %v125_v14 = vcombine.low %v236_v10, %v240_v12 }
  0xf2   :  { %v211_v15 = vcombine.low %v238_v11, %v242_v13 }
  0xf3   :  { %127 = vst [vmem:[%s321_s2] sm:$0x77] %v125_v14 }
  0xf4   :  { %227 = vst [vmem:[%s321_s2 + $0x8] sm:$0x77] %v211_v15 }
  0xf5   :  { %219 = vsyncpa [#allocation3], 1 }
  0xf6   :  { %220 = vsyncpa [#allocation5], 1 }

</bundles_post_ra>
